<compile_context>
chip_gen: v7x
topology: tpu7x:2x2x1
jax: 0.10.0
libtpu: 0.0.40
codegen_flags: <defaults>
</compile_context>

<pallas_src>
import jax
import jax.numpy as jnp
from jax.experimental import pallas as pl
from jax.experimental.pallas import tpu as pltpu


def _round_up(n: int, m: int) -> int:
    return ((n + m - 1) // m) * m


def mlp_kernel(xt_ref, w1t_ref, b1t_ref, w2r_ref, b2_ref, o_ref):
    # ----- Layer 1: h_t = W1^T @ x_t + b1, ReLU ----------------------------
    # (hidden, in) @ (in, bt) -> (hidden, bt); batch stays on lanes, so the
    # bias broadcast and ReLU are plain per-lane VPU ops.
    h = jnp.dot(w1t_ref[...], xt_ref[...], preferred_element_type=jnp.float32)
    h = jnp.maximum(h + b1t_ref[...], 0.0)                      # (hidden, bt) f32

    # ----- Layer 2: y_t = w2_row @ h_t + b2 ---------------------------------
    # (1, hidden) @ (hidden, bt) -> (1, bt): lane-dense, unmasked stores.
    y = jnp.dot(w2r_ref[...], h, preferred_element_type=jnp.float32)
    o_ref[...] = (y + b2_ref[0, 0]).astype(o_ref.dtype)


def mlp_forward(x, w1, b1, w2, b2, *, block_b: int = 2048):
    """x: (B, in) f32; w1: (in, hidden); b1: (1, hidden); w2: (hidden, 1);
    b2: (1, 1).  Returns (B, 1) f32 (same math as the PyTorch MLP forward)."""
    B, in_size = x.shape
    hidden, out_size = w2.shape
    assert w1.shape == (in_size, hidden)
    assert b1.shape == (1, hidden)
    assert out_size == 1, "kernel is specialized for output_size == 1"

    # Tile the batch (lane axis). Small batches round up to one lane-dense
    # tile; large batches use block_b, capped so the grid keeps >= 2 steps for
    # the "parallel" axis (v7x megacore sharding).
    if B <= block_b:
        b_tile = _round_up(B, 128)
    else:
        b_tile = min(block_b, _round_up((B + 1) // 2, 128))
    b_pad = _round_up(B, b_tile)

    # Batch-on-lanes layouts (wrapper-side layout plumbing only).
    x_t = x.T                                     # (in, B)
    if b_pad != B:
        x_t = jnp.pad(x_t, ((0, 0), (0, b_pad - B)))
    w1t = w1.T                                    # (hidden, in)
    b1t = b1.reshape(hidden, 1)                   # (hidden, 1) broadcast over lanes
    w2r = w2.T                                    # (1, hidden)
    b2s = b2.reshape(1, 1)                        # scalar -> SMEM

    grid = (b_pad // b_tile,)

    flops = 2 * B * (in_size * hidden + hidden * out_size)
    bytes_accessed = (x_t.size + w1t.size + b1t.size + w2r.size + b2s.size
                      + out_size * b_pad) * 4

    out_t = pl.pallas_call(
        mlp_kernel,
        out_shape=jax.ShapeDtypeStruct((out_size, b_pad), jnp.float32),
        grid_spec=pltpu.PrefetchScalarGridSpec(
            num_scalar_prefetch=0,
            grid=grid,
            in_specs=[
                # x_t: streamed along the batch (grid/lane) axis.
                pl.BlockSpec((in_size, b_tile), lambda i: (0, i)),
                # Weights / b1: constant block index -> VMEM-resident, no re-DMA.
                pl.BlockSpec(w1t.shape, lambda i: (0, 0)),
                pl.BlockSpec(b1t.shape, lambda i: (0, 0)),
                pl.BlockSpec(w2r.shape, lambda i: (0, 0)),
                # b2: single scalar kept in SMEM (no dedicated VMEM tile/DMA).
                pl.BlockSpec(memory_space=pltpu.MemorySpace.SMEM),
            ],
            out_specs=pl.BlockSpec((out_size, b_tile), lambda i: (0, i)),
        ),
        compiler_params=pltpu.CompilerParams(
            dimension_semantics=("parallel",),      # shard batch tiles across TCs
            vmem_limit_bytes=32 * 1024 * 1024,      # tiles are tiny; safe on v5e/v6e/v7x
        ),
        cost_estimate=pl.CostEstimate(
            flops=flops, transcendentals=0, bytes_accessed=bytes_accessed),
    )(x_t, w1t, b1t, w2r, b2s)

    # Back to nn.Linear's (B, out) row-major output layout.
    return out_t[:, :B].T


def init_params(key, input_size=10, hidden_size=50, output_size=1):
    k1, k2, k3, k4 = jax.random.split(key, 4)
    # nn.Linear-style uniform(-1/sqrt(fan_in), +1/sqrt(fan_in)) init.
    lim1 = 1.0 / jnp.sqrt(jnp.float32(input_size))
    lim2 = 1.0 / jnp.sqrt(jnp.float32(hidden_size))
    w1 = jax.random.uniform(k1, (input_size, hidden_size), jnp.float32, -lim1, lim1)
    b1 = jax.random.uniform(k2, (1, hidden_size), jnp.float32, -lim1, lim1)
    w2 = jax.random.uniform(k3, (hidden_size, output_size), jnp.float32, -lim2, lim2)
    b2 = jax.random.uniform(k4, (1, output_size), jnp.float32, -lim2, lim2)
    return w1, b1, w2, b2


def _reference(x, w1, b1, w2, b2):
    h = jnp.maximum(jnp.dot(x, w1, preferred_element_type=jnp.float32) + b1, 0.0)
    return jnp.dot(h, w2, preferred_element_type=jnp.float32) + b2


if __name__ == "__main__":
    key = jax.random.PRNGKey(0)
    kx, kp = jax.random.split(key)

    batch, input_size, hidden_size, output_size = 8, 10, 50, 1
    x = jax.random.normal(kx, (batch, input_size), jnp.float32)
    w1, b1, w2, b2 = init_params(kp, input_size, hidden_size, output_size)

    out = jax.block_until_ready(mlp_forward(x, w1, b1, w2, b2))
    ref = _reference(x, w1, b1, w2, b2)
    assert out.shape == (batch, output_size)
    assert jnp.allclose(out, ref, atol=1e-2, rtol=1e-2)

    # Also exercise the multi-tile grid path (padding + >=2 grid steps, parallel axis).
    x_big = jax.random.normal(kx, (5000, input_size), jnp.float32)
    out_big = jax.block_until_ready(mlp_forward(x_big, w1, b1, w2, b2))
    ref_big = _reference(x_big, w1, b1, w2, b2)
    assert out_big.shape == (5000, output_size)
    assert jnp.allclose(out_big, ref_big, atol=1e-2, rtol=1e-2)

    print("KERNEL_OK")
</pallas_src>

<mosaic_0001>
module attributes {stable_mosaic.version = 11 : i64} {
  func.func @mlp_kernel(%arg0: i32, %arg1: memref<10x128xf32, #tpu.memory_space<vmem>>, %arg2: memref<50x10xf32, #tpu.memory_space<vmem>>, %arg3: memref<50x1xf32, #tpu.memory_space<vmem>>, %arg4: memref<1x50xf32, #tpu.memory_space<vmem>>, %arg5: memref<1x1xf32, #tpu.memory_space<smem>>, %arg6: memref<1x128xf32, #tpu.memory_space<vmem>>) attributes {dimension_semantics = [#tpu.dimension_semantics<parallel>], iteration_bounds = array<i64: 1>, scalar_prefetch = 0 : i64, scratch_operands = 0 : i64, tpu.core_type = #tpu.core_type<tc>, window_params = [{transform_indices = @transform_0, window_bounds = array<i64: 10, 128>}, {pipeline_mode = #tpu.pipeline_mode<synchronous>, transform_indices = @transform_1, window_bounds = array<i64: 50, 10>}, {pipeline_mode = #tpu.pipeline_mode<synchronous>, transform_indices = @transform_2, window_bounds = array<i64: 50, 1>}, {pipeline_mode = #tpu.pipeline_mode<synchronous>, transform_indices = @transform_3, window_bounds = array<i64: 1, 50>}, {transform_indices = @transform_4, window_bounds = array<i64: 1, 1>}, {transform_indices = @transform_5, window_bounds = array<i64: 1, 128>}]} {
    %c0 = arith.constant 0 : index
    %c0_0 = arith.constant 0 : index
    %0 = vector.load %arg2[%c0, %c0_0] : memref<50x10xf32, #tpu.memory_space<vmem>>, vector<50x10xf32>
    %c0_1 = arith.constant 0 : index
    %c0_2 = arith.constant 0 : index
    %1 = vector.load %arg1[%c0_1, %c0_2] : memref<10x128xf32, #tpu.memory_space<vmem>>, vector<10x128xf32>
    %cst = arith.constant dense<0.000000e+00> : vector<50x128xf32>
    %2 = tpu.matmul %0, %1, %cst {dimension_numbers = #tpu.dot_dimension_numbers<[1], [0], [0], [1], [0, 0, 1, 1], [], []>} : vector<50x10xf32>, vector<10x128xf32>, vector<50x128xf32> -> vector<50x128xf32>
    %c0_3 = arith.constant 0 : index
    %c0_4 = arith.constant 0 : index
    %3 = vector.load %arg3[%c0_3, %c0_4] : memref<50x1xf32, #tpu.memory_space<vmem>>, vector<50x1xf32>
    %4 = vector.broadcast %3 : vector<50x1xf32> to vector<50x128xf32>
    %5 = arith.addf %2, %4 : vector<50x128xf32>
    %cst_5 = arith.constant 0.000000e+00 : f32
    %6 = vector.broadcast %cst_5 : f32 to vector<50x128xf32>
    %7 = arith.maximumf %5, %6 : vector<50x128xf32>
    %c0_6 = arith.constant 0 : index
    %c0_7 = arith.constant 0 : index
    %8 = vector.load %arg4[%c0_6, %c0_7] : memref<1x50xf32, #tpu.memory_space<vmem>>, vector<1x50xf32>
    %cst_8 = arith.constant dense<0.000000e+00> : vector<1x128xf32>
    %9 = tpu.matmul %8, %7, %cst_8 {dimension_numbers = #tpu.dot_dimension_numbers<[1], [0], [0], [1], [0, 0, 1, 1], [], []>} : vector<1x50xf32>, vector<50x128xf32>, vector<1x128xf32> -> vector<1x128xf32>
    %c0_9 = arith.constant 0 : index
    %c0_10 = arith.constant 0 : index
    %10 = memref.load %arg5[%c0_9, %c0_10] : memref<1x1xf32, #tpu.memory_space<smem>>
    %11 = vector.broadcast %10 : f32 to vector<1x128xf32>
    %12 = arith.addf %9, %11 : vector<1x128xf32>
    %c0_11 = arith.constant 0 : index
    %c0_12 = arith.constant 0 : index
    %13 = vector.load %arg6[%c0_11, %c0_12] : memref<1x128xf32, #tpu.memory_space<vmem>>, vector<1x128xf32>
    tpu.vector_store %arg6[%c0_11, %c0_12], %12 {strides = array<i32>} : memref<1x128xf32, #tpu.memory_space<vmem>>, vector<1x128xf32>,
    return
  }
  func.func @transform_0(%arg0: i32) -> (i32, i32) {
    %c0_i32 = arith.constant 0 : i32
    %c0_i32_0 = arith.constant 0 : i32
    return %c0_i32, %arg0 : i32, i32
  }
  func.func @transform_1(%arg0: i32) -> (i32, i32) {
    %c0_i32 = arith.constant 0 : i32
    %c0_i32_0 = arith.constant 0 : i32
    %c0_i32_1 = arith.constant 0 : i32
    return %c0_i32, %c0_i32_0 : i32, i32
  }
  func.func @transform_2(%arg0: i32) -> (i32, i32) {
    %c0_i32 = arith.constant 0 : i32
    %c0_i32_0 = arith.constant 0 : i32
    %c0_i32_1 = arith.constant 0 : i32
    return %c0_i32, %c0_i32_0 : i32, i32
  }
  func.func @transform_3(%arg0: i32) -> (i32, i32) {
    %c0_i32 = arith.constant 0 : i32
    %c0_i32_0 = arith.constant 0 : i32
    %c0_i32_1 = arith.constant 0 : i32
    return %c0_i32, %c0_i32_0 : i32, i32
  }
  func.func @transform_4(%arg0: i32) -> (i32, i32) {
    %c0_i32 = arith.constant 0 : i32
    %c0_i32_0 = arith.constant 0 : i32
    %c0_i32_1 = arith.constant 0 : i32
    return %c0_i32, %c0_i32_0 : i32, i32
  }
  func.func @transform_5(%arg0: i32) -> (i32, i32) {
    %c0_i32 = arith.constant 0 : i32
    %c0_i32_0 = arith.constant 0 : i32
    return %c0_i32, %arg0 : i32, i32
  }
}

</mosaic_0001>

<bundles_post_ra>
// kernel: tpu_custom_call.1
= control target key start
LH: loop header
LB: loop body
LE: loop exit
PB: predicated region body
PF: predicated region fallthrough
CT: control target
= control target key end

     0   :  { %vm95_vm0 = vcmask 1041408   ;;  %v415_v2 = vmov 0.0|0.0   ;;  %vm416_vm1 = vmmov 1   ;;  %vm417_vm3 = vmmov 0   ;;  %s547_s0 = inlined_call_operand.vmem [shape: f32[10,128], index: 0, kind: input, shape index: {}]   ;;  %s548_s1 = inlined_call_operand.vmem [shape: f32[50,10], index: 1, kind: input, shape index: {}]   ;;  %s549_s2 = inlined_call_operand.vmem [shape: f32[50,1], index: 2, kind: input, shape index: {}]   ;;  %s550_s3 = inlined_call_operand.vmem [shape: f32[1,50], index: 3, kind: input, shape index: {}]   ;;  %s551_s4 = inlined_call_operand.<no memory space> [shape: f32[1,1], index: 4, kind: input, shape index: {}]   ;;  %s552_s5 = inlined_call_operand.hbm [shape: f32[1,128], index: 5, kind: output, shape index: {}]  }
   0x1   :  { %v29_v0 = vld [vmem:[%s547_s0] sm:$0xff]  ;;  %v30_v1 = vld [vmem:[%s547_s0 + $0x8] sm:$0x3]  ;;  %370 = vmatprep.subr.bf16.mxu0 %v415_v2  ;;  %vm372_vm2 = vmpackc.low %vm95_vm0, %vm416_vm1  ;;  %374 = vmatprep.subr.bf16.mxu1 %v415_v2  ;;  %v418_v4 = vmov 0.0   ;;  %vm73_vm4 = vcmask 80896   ;;  %v419_v6 = vmov 0  }
   0x2   :  { %v371_v3 = vpack.c.bf16 %v30_v1, %v29_v0  ;;  %332 = vmatprep.mubr.msk.f32.mxu0 %vm417_vm3, %v418_v4  ;;  %367 = vmatprep.mubr.msk.f32.mxu1 %vm417_vm3, %v418_v4  ;;  %v22_v5 = vld [vmem:[%s548_s1] sm:$0xff]  ;;  %v33_v8 = vld [vmem:[%s549_s2 + $0x10] sm:$0xff]  ;;  %v32_v9 = vld [vmem:[%s549_s2 + $0x8] sm:$0xff] }
   0x3   :  { %389 = vset.pattern.permute.xlu0 %v419_v6  ;;  %v31_v7 = vld [vmem:[%s549_s2] sm:$0xff]  ;;  %390 = vset.pattern.permute.xlu1 %v419_v6  ;;  %v34_v10 = vld [vmem:[%s549_s2 + $0x18] sm:$0xff] }
   0x4   :  { %373 = vmatpush3.bf16.msk.msra.mxu0 %vm372_vm2, %v371_v3  ;;  %40 = vperm.xlu0 %389, %v31_v7  }
   0x5   :  { %50 = vperm.xlu1 %390, %v33_v8  }
   0x7   :  { %333 = vmatmul.mubr.msk.f32.vlgmr.msra.gmra.mrb[0].mxu0 %vm73_vm4, %v22_v5 }
   0x8   :  { %11 = vsyncpa [#allocation4], 0  ;;  %335 = vmatprep.mubr.msk.f32.mxu0 %vm417_vm3, %v418_v4  ;;  %v23_v11 = vld [vmem:[%s548_s1 + $0x8] sm:$0xff]  ;;  %45 = vperm.xlu0 %389, %v32_v9   ;;  %v35_v12 = vld [vmem:[%s549_s2 + $0x20] sm:$0xff]  ;;  %vm209_vm5 = vcmask 408576   ;;  %v208_v59 = vstv %s551_s4  ;;  %s420_s25 = smov [#allocation3]  }
   0x9   :  { %55 = vperm.xlu1 %390, %v34_v10   ;;  %v36_v13 = vld [vmem:[%s549_s2 + $0x28] sm:$0xff]  ;;  %v24_v14 = vld [vmem:[%s548_s1 + $0x10] sm:$0xff]  ;;  %v25_v16 = vld [vmem:[%s548_s1 + $0x18] sm:$0xff]  ;;  %s293_s26 = sshll.u32 %s420_s25, 4  ;;  %s294_s26 = int_to_ptr.vmem [resolvable:$true] %s293_s26 }
   0xa   :  { %v37_v15 = vld [vmem:[%s549_s2 + $0x30] sm:$0x3]  ;;  %v26_v17 = vld [vmem:[%s548_s1 + $0x20] sm:$0xff]  ;;  %v27_v18 = vld [vmem:[%s548_s1 + $0x28] sm:$0xff]  ;;  %s391_s27 = scalar_lea.vmem %s294_s26, 16  ;;  %s395_s28 = scalar_lea.vmem %s294_s26, 32 }
   0xb   :  { %336 = vmatmul.mubr.msk.f32.gmra.mrb[2].mxu0 %vm73_vm4, %v23_v11  ;;  %v28_v19 = vld [vmem:[%s548_s1 + $0x30] sm:$0x3]  ;;  %v206_v58 = vld [vmem:[%s550_s3] sm:$0x1]  ;;  %p392_p0 = scmp.ne.s32.totalorder %s294_s26, %s391_s27  ;;  %p396_p1 = scmp.lt.s32.totalorder %s294_s26, %s294_s26 }
   0xc   :  { %338 = vmatprep.mubr.msk.f32.mxu0 %vm417_vm3, %v418_v4  ;;  %60 = vperm.xlu0 %389, %v35_v12   ;;  %p397_p2 = scmp.lt.s32.totalorder %s395_s28, %s391_s27 }
   0xd   :  { %65 = vperm.xlu1 %390, %v36_v13  }
   0xe   :  { %p398_p3 = por %p397_p2, %p396_p1 }
   0xf   :  { %339 = vmatmul.mubr.msk.f32.gmra.mrb[4].mxu0 %vm73_vm4, %v24_v14 }
  0x10   :  { %341 = vmatprep.mubr.msk.f32.mxu0 %vm417_vm3, %v418_v4  ;;  %70 = vperm.xlu0 %389, %v37_v15   ;;  %p399_p4 = pnand %p398_p3, %p392_p0 }
  0x13   :  { %342 = vmatmul.mubr.msk.f32.gmra.mrb[6].mxu0 %vm73_vm4, %v25_v16 }
  0x14   :  { %344 = vmatprep.mubr.msk.f32.mxu0 %vm417_vm3, %v418_v4 }
  0x17   :  { %345 = vmatmul.mubr.msk.f32.gmra.mrb[8].mxu0 %vm73_vm4, %v26_v17 }
  0x18   :  { %347 = vmatprep.mubr.msk.f32.mxu0 %vm417_vm3, %v418_v4 }
  0x1b   :  { %348 = vmatmul.mubr.msk.f32.gmra.mrb[10].mxu0 %vm73_vm4, %v27_v18 }
  0x1c   :  { %350 = vmatprep.mubr.msk.f32.mxu0 %vm417_vm3, %v418_v4 }
  0x1f   :  { %351 = vmatmul.mubr.msk.f32.gmra.mrb[12].mxu0 %vm73_vm4, %v28_v19 }
  0x83   :  { %v41_v20 = vpop.permute.xlu0 %40 }
  0x84   :  { %v51_v28 = vpop.permute.xlu1 %50 }
  0x87   :  { %v46_v24 = vpop.permute.xlu0 %45 }
  0x88   :  { %v56_v35 = vpop.permute.xlu1 %55 }
  0x8b   :  { %v61_v44 = vpop.permute.xlu0 %60 }
  0x8c   :  { %v66_v46 = vpop.permute.xlu1 %65 }
  0x8f   :  { %v71_v52 = vpop.permute.xlu0 %70 }
  0xda   :  { %v165_v21 = vpop.f32.mrb[0].mxu0 }
  0xdb   :  { %v334_v22 = vpop.f32.mrb[1].mxu0  ;;  %v166_v23 = vadd.f32 %v165_v21, %v41_v20 }
  0xdd   :  { %v199_v29 = vmax.f32 %v166_v23, 0.0 }
  0xde   :  { %v170_v25 = vpop.f32.mrb[2].mxu0 }
  0xdf   :  { %v171_v26 = vadd.f32 %v170_v25, %v46_v24  ;;  %v337_v27 = vpop.f32.mrb[3].mxu0 }
  0xe1   :  { %v200_v30 = vmax.f32 %v171_v26, 0.0 }
  0xe2   :  { %v175_v31 = vpop.f32.mrb[4].mxu0 }
  0xe3   :  { %v340_v32 = vpop.f32.mrb[5].mxu0  ;;  %v375_v33 = vpack.c.bf16 %v200_v30, %v199_v29  ;;  %v176_v34 = vadd.f32 %v175_v31, %v51_v28 }
  0xe5   :  { %376 = vmatpush3.bf16.msra.mxu1 %v375_v33  ;;  %v201_v39 = vmax.f32 %v176_v34, 0.0 }
  0xe6   :  { %v180_v36 = vpop.f32.mrb[6].mxu0  ;;  %377 = vmatprep.subr.bf16.mxu1 %v415_v2 }
  0xe7   :  { %v181_v37 = vadd.f32 %v180_v36, %v56_v35  ;;  %v343_v38 = vpop.f32.mrb[7].mxu0 }
  0xe9   :  { %v202_v40 = vmax.f32 %v181_v37, 0.0 }
  0xea   :  { %v185_v41 = vpop.f32.mrb[8].mxu0 }
  0xeb   :  { %v378_v42 = vpack.c.bf16 %v202_v40, %v201_v39  ;;  %v346_v43 = vpop.f32.mrb[9].mxu0  ;;  %v186_v45 = vadd.f32 %v185_v41, %v61_v44 }
  0xed   :  { %379 = vmatpush3.bf16.msra.mxu1 %v378_v42  ;;  %v203_v50 = vmax.f32 %v186_v45, 0.0 }
  0xee   :  { %v190_v47 = vpop.f32.mrb[10].mxu0  ;;  %380 = vmatprep.subr.bf16.mxu1 %v415_v2 }
  0xef   :  { %v191_v48 = vadd.f32 %v190_v47, %v66_v46  ;;  %v349_v49 = vpop.f32.mrb[11].mxu0 }
  0xf1   :  { %v204_v51 = vmax.f32 %v191_v48, 0.0 }
  0xf2   :  { %v195_v53 = vpop.f32.mrb[12].mxu0 }
  0xf3   :  { %v381_v54 = vpack.c.bf16 %v204_v51, %v203_v50  ;;  %v196_v55 = vadd.f32 %v195_v53, %v71_v52  ;;  %v352_v56 = vpop.f32.mrb[13].mxu0 }
  0xf5   :  { %382 = vmatpush3.bf16.msra.mxu1 %v381_v54  ;;  %v205_v57 = vmax.f32 %v196_v55, 0.0 }
  0xf6   :  { %365 = vmatprep.subr.mxu1 %v418_v4 }
  0xf9   :  { %366 = vmatpush3.msk.msra.mxu1 %vm95_vm0, %v205_v57 }
  0xfa   :  { %368 = vmatmul.mubr.msk.f32.vlgmr.msra.gmra.mrb[0].mxu1 %vm209_vm5, %v206_v58 }
 0x1cd   :  { %v282_v60 = vpop.f32.mrb[0].mxu1 }
 0x1ce   :  { %v283_v61 = vadd.f32 %v282_v60, %v208_v59  ;;  %v369_v62 = vpop.f32.mrb[1].mxu1 }
 0x1d0   :  { %286 = vst [vmem:[#allocation3] sm:$0x1] %v283_v61 }
 0x1d1   :  { %402 = shalt.err (!%p399_p4)
}
 0x1d2   :  { %s403_s30 = scalar_lea.hbm %s552_s5, 16 }
 0x1d3   :  { %p404_p5 = scmp.ne.s32.totalorder %s552_s5, %s403_s30  ;;  %p407_p6 = scmp.lt.u32.totalorder %s403_s30, %s552_s5 }
 0x1d5   :  { %p409_p7 = pnand %p407_p6, %p404_p5 }
 0x1d7   :  { %412 = shalt.err (!%p409_p7)
}
 0x1d8   :  { %296 = dma.vmem_to_hbm [thread:$0]  %s294_s26, 16, %s552_s5, [#allocation4]  }
 0x1d9   :  { %413 = dma.done.wait [#allocation4], 16  }
 0x1da   :  { %414 = vsyncadd [#allocation4], 4294967280 }
 0x1db   :  { %300 = vsyncpa [#allocation4], 1 }

</bundles_post_ra>
